<compile_context>
chip_gen: v6e
topology: v6e:2x2x1
jax: 0.10.0
libtpu: 0.0.40
codegen_flags: <defaults>
</compile_context>

<pallas_src>
import functools
import math

import jax
import jax.numpy as jnp
from jax.experimental import pallas as pl
from jax.experimental.pallas import tpu as pltpu


def _round_up(x: int, m: int) -> int:
    return ((x + m - 1) // m) * m


def _vmem_limit_bytes():
    # Per-generation VMEM cap: never ask for more than ~3/4 of physical VMEM
    # (v7x has only 64 MiB), default to 48 MiB otherwise.
    default = 48 * 1024 * 1024
    try:
        cap = pltpu.get_tpu_info().vmem_capacity_bytes
        return int(min(default, (cap * 3) // 4))
    except Exception:
        return 32 * 1024 * 1024


_VMEM_LIMIT_BYTES = _vmem_limit_bytes()


# --------------------------------------------------------------------------
# Kernels
# --------------------------------------------------------------------------
def lora_linear_kernel(x_ref, wt_ref, b_ref, bt_ref, at_ref, o_ref,
                       acc_ref, u_ref, *, u_every_j):
    """Grid (i, j, k): i over M tiles, j over N tiles, k over K tiles (last).

    acc_ref : f32 [tm, tn]   accumulator for x @ W.T
    u_ref   : f32 [tm, rpad] accumulator for x @ B.T (LoRA left factor)
    """
    j = pl.program_id(1)
    k = pl.program_id(2)

    @pl.when(k == 0)
    def _init_acc():
        acc_ref[...] = jnp.zeros_like(acc_ref)

    x = x_ref[...]  # bf16 [tm, tk]
    # Base matmul: bf16 x bf16 -> f32 accumulate on the MXU.
    acc_ref[...] += jnp.dot(x, wt_ref[...], preferred_element_type=jnp.float32)

    # LoRA left factor u = x @ B.T.  When u_every_j is False it is computed
    # only for j == 0 and reused from scratch for every other j tile of the
    # same i (scratch persists across grid steps; k is the innermost axis and
    # j == 0 runs before j > 0 on the core that owns this i).
    def _accum_u():
        @pl.when(k == 0)
        def _init_u():
            u_ref[...] = jnp.zeros_like(u_ref)
        u_ref[...] += jnp.dot(x, bt_ref[...],
                              preferred_element_type=jnp.float32)

    if u_every_j:
        _accum_u()
    else:
        pl.when(j == 0)(_accum_u)

    @pl.when(k == pl.num_programs(2) - 1)
    def _finalize():
        # scaling is already folded into at (wrapper); rank is zero-padded to
        # a 128-lane multiple so the extra columns contribute nothing.
        lora = jnp.dot(u_ref[...], at_ref[...],
                       preferred_element_type=jnp.float32)
        o_ref[...] = (acc_ref[...] + b_ref[...] + lora).astype(o_ref.dtype)


def base_linear_kernel(x_ref, wt_ref, b_ref, o_ref, acc_ref):
    """enable_lora=False path: plain tiled x @ W.T + bias."""
    k = pl.program_id(2)

    @pl.when(k == 0)
    def _init():
        acc_ref[...] = jnp.zeros_like(acc_ref)

    acc_ref[...] += jnp.dot(x_ref[...], wt_ref[...],
                            preferred_element_type=jnp.float32)

    @pl.when(k == pl.num_programs(2) - 1)
    def _finalize():
        o_ref[...] = (acc_ref[...] + b_ref[...]).astype(o_ref.dtype)


# --------------------------------------------------------------------------
# Wrappers
# --------------------------------------------------------------------------
def prepare_lora_linear_params(w, b, lora_A=None, lora_B=None, lora_alpha=None,
                               *, enable_lora=True, tn=512, tk=1024,
                               compute_dtype=jnp.bfloat16):
    """One-time parameter setup (hoisted out of the per-call hot path):
    transpose, pad to tile multiples, cast weights to the MXU compute dtype,
    fold the LoRA scaling into A.T."""
    N, K = w.shape
    tn = min(tn, _round_up(N, 128))
    tk = min(tk, _round_up(K, 128))
    Np, Kp = _round_up(N, tn), _round_up(K, tk)

    wt = w.T.astype(compute_dtype)                                   # [K, N]
    if (Kp, Np) != (K, N):
        wt = jnp.pad(wt, ((0, Kp - K), (0, Np - N)))
    bp = b.astype(jnp.float32).reshape(1, N)
    if Np != N:
        bp = jnp.pad(bp, ((0, 0), (0, Np - N)))

    params = dict(wt=wt, b=bp, N=N, K=K, Np=Np, Kp=Kp, tn=tn, tk=tk,
                  compute_dtype=compute_dtype, enable_lora=enable_lora)

    if enable_lora:
        r = lora_A.shape[1]
        r_pad = _round_up(r, 128)   # lane-dense rank dimension
        scaling = jnp.asarray(lora_alpha, jnp.float32).reshape(()) / math.sqrt(r)
        bt = lora_B.T.astype(compute_dtype)                          # [K, r]
        bt = jnp.pad(bt, ((0, Kp - K), (0, r_pad - r)))
        at = scaling * lora_A.T.astype(jnp.float32)                  # [r, N]
        at = jnp.pad(at, ((0, r_pad - r), (0, Np - N)))
        params.update(bt=bt, at=at, rank=r, r_pad=r_pad)
    return params


def lora_linear_apply(params, x, *, tm=512):
    """x: [..., in_features] -> [..., out_features] using prepared params."""
    orig_shape = x.shape
    K, N = params["K"], params["N"]
    Kp, Np = params["Kp"], params["Np"]
    tn, tk = params["tn"], params["tk"]
    cdt = params["compute_dtype"]

    x2 = x.reshape(-1, K)
    M = x2.shape[0]
    tm = min(tm, _round_up(M, 8))
    Mp = _round_up(M, tm)
    xp = x2.astype(cdt)
    if (Mp, Kp) != (M, K):
        xp = jnp.pad(xp, ((0, Mp - M), (0, Kp - K)))

    grid = (Mp // tm, Np // tn, Kp // tk)
    x_spec = pl.BlockSpec((tm, tk), lambda i, j, k: (i, k))
    wt_spec = pl.BlockSpec((tk, tn), lambda i, j, k: (k, j))
    b_spec = pl.BlockSpec((1, tn), lambda i, j, k: (0, j))
    out_spec = pl.BlockSpec((tm, tn), lambda i, j, k: (i, j))
    out_shape = jax.ShapeDtypeStruct((Mp, Np), x.dtype)

    if params["enable_lora"]:
        r_pad = params["r_pad"]
        # If there's only one i tile but several j tiles (decode-style), keep
        # the per-j u recomputation so the j axis can stay "parallel" and both
        # v7x TensorCores get work; otherwise dedup u across j tiles.
        u_every_j = (grid[0] == 1 and grid[1] > 1)
        sem = ("parallel", "parallel" if u_every_j else "arbitrary", "arbitrary")
        kernel = functools.partial(lora_linear_kernel, u_every_j=u_every_j)
        grid_spec = pltpu.PrefetchScalarGridSpec(
            num_scalar_prefetch=0,
            grid=grid,
            in_specs=[
                x_spec,
                wt_spec,
                b_spec,
                pl.BlockSpec((tk, r_pad), lambda i, j, k: (k, 0)),   # B.T tiles
                pl.BlockSpec((r_pad, tn), lambda i, j, k: (0, j)),   # A.T tiles
            ],
            out_specs=out_spec,
            scratch_shapes=[pltpu.VMEM((tm, tn), jnp.float32),
                            pltpu.VMEM((tm, r_pad), jnp.float32)],
        )
        out_p = pl.pallas_call(
            kernel,
            out_shape=out_shape,
            grid_spec=grid_spec,
            compiler_params=pltpu.CompilerParams(
                dimension_semantics=sem,
                vmem_limit_bytes=_VMEM_LIMIT_BYTES),
        )(xp, params["wt"], params["b"], params["bt"], params["at"])
    else:
        grid_spec = pltpu.PrefetchScalarGridSpec(
            num_scalar_prefetch=0,
            grid=grid,
            in_specs=[x_spec, wt_spec, b_spec],
            out_specs=out_spec,
            scratch_shapes=[pltpu.VMEM((tm, tn), jnp.float32)],
        )
        out_p = pl.pallas_call(
            base_linear_kernel,
            out_shape=out_shape,
            grid_spec=grid_spec,
            compiler_params=pltpu.CompilerParams(
                dimension_semantics=("parallel", "parallel", "arbitrary"),
                vmem_limit_bytes=_VMEM_LIMIT_BYTES),
        )(xp, params["wt"], params["b"])

    return out_p[:M, :N].reshape(*orig_shape[:-1], N)


def lora_linear(x, w, b, lora_A=None, lora_B=None, lora_alpha=None, *,
                enable_lora=True, tm=512, tn=512, tk=1024):
    """One-shot convenience wrapper (prepare + apply)."""
    params = prepare_lora_linear_params(
        w, b, lora_A, lora_B, lora_alpha, enable_lora=enable_lora, tn=tn, tk=tk)
    return lora_linear_apply(params, x, tm=tm)


# --------------------------------------------------------------------------
# Self-test
# --------------------------------------------------------------------------
def _make_inputs(key, batch, seq, in_features, out_features, rank_divisor):
    MIN_RANK = 4
    rank = max(MIN_RANK, in_features // rank_divisor)
    rank = min(out_features, rank)
    kx, kw, kb, ka, kbm = jax.random.split(key, 5)
    lin_bound = 1.0 / math.sqrt(in_features)
    w = jax.random.uniform(kw, (out_features, in_features), jnp.float32,
                           -lin_bound, lin_bound)
    b = jax.random.uniform(kb, (out_features,), jnp.float32,
                           -lin_bound, lin_bound)
    a_bound = 1.0 / math.sqrt(rank)
    lora_A = jax.random.uniform(ka, (out_features, rank), jnp.float32,
                                -a_bound, a_bound)
    # Module inits lora_B to zeros; use small random values so the LoRA path
    # contributes non-trivially in this synthetic test.
    lora_B = 0.02 * jax.random.normal(kbm, (rank, in_features), jnp.float32)
    x = jax.random.normal(kx, (batch, seq, in_features), jnp.float32)
    return x, w, b, lora_A, lora_B, rank


def _reference(x, w, b, lora_A, lora_B, lora_alpha, rank):
    scaling = jnp.asarray(lora_alpha, jnp.float32).reshape(()) / math.sqrt(rank)
    x2 = x.reshape(-1, x.shape[-1])
    base = x2 @ w.T + b
    full = base + scaling * (x2 @ (lora_A @ lora_B).T)
    shp = (*x.shape[:-1], w.shape[0])
    return base.reshape(shp), full.reshape(shp)


if __name__ == "__main__":
    key = jax.random.PRNGKey(0)
    k1, k2 = jax.random.split(key)

    # --- Test 1: module-sized small shapes, default tiles (single-tile grid).
    batch, seq, in_f, out_f = 2, 8, 32, 32
    x, w, b, lora_A, lora_B, rank = _make_inputs(k1, batch, seq, in_f, out_f, 4)
    lora_alpha = jnp.array([0.1], dtype=jnp.float32)

    params = prepare_lora_linear_params(w, b, lora_A, lora_B, lora_alpha,
                                        enable_lora=True)
    out = jax.block_until_ready(lora_linear_apply(params, x))

    params_base = prepare_lora_linear_params(w, b, enable_lora=False)
    out_base = jax.block_until_ready(lora_linear_apply(params_base, x))

    ref_base, ref = _reference(x, w, b, lora_A, lora_B, lora_alpha, rank)
    assert out.shape == (batch, seq, out_f)
    # bf16 MXU operands with f32 accumulation -> loosened tolerances vs f32 ref.
    assert jnp.allclose(out, ref, atol=3e-2, rtol=3e-2)
    assert jnp.allclose(out_base, ref_base, atol=3e-2, rtol=3e-2)

    # --- Test 2: small tiles forced so the (i, j, k) grid is multi-tile and
    # the K-accumulation + j>0 reuse of the u scratch are exercised.
    batch2, seq2, in_f2, out_f2 = 2, 8, 256, 256
    x2_, w2, b2, lora_A2, lora_B2, rank2 = _make_inputs(k2, batch2, seq2,
                                                        in_f2, out_f2, 4)
    params2 = prepare_lora_linear_params(w2, b2, lora_A2, lora_B2, 0.1,
                                         enable_lora=True, tn=128, tk=128)
    out2 = jax.block_until_ready(lora_linear_apply(params2, x2_, tm=8))
    _, ref2 = _reference(x2_, w2, b2, lora_A2, lora_B2, 0.1, rank2)
    assert out2.shape == (batch2, seq2, out_f2)
    assert jnp.allclose(out2, ref2, atol=5e-2, rtol=5e-2)

    print("KERNEL_OK")
</pallas_src>

<mosaic_0001>
module attributes {stable_mosaic.version = 11 : i64} {
  func.func @lora_linear_kernel(%arg0: i32, %arg1: i32, %arg2: i32, %arg3: memref<16x128xbf16, #tpu.memory_space<vmem>>, %arg4: memref<128x128xbf16, #tpu.memory_space<vmem>>, %arg5: memref<1x128xf32, #tpu.memory_space<vmem>>, %arg6: memref<128x128xbf16, #tpu.memory_space<vmem>>, %arg7: memref<128x128xf32, #tpu.memory_space<vmem>>, %arg8: memref<16x128xf32, #tpu.memory_space<vmem>>, %arg9: memref<16x128xf32, #tpu.memory_space<vmem>>, %arg10: memref<16x128xf32, #tpu.memory_space<vmem>>) attributes {dimension_semantics = [#tpu.dimension_semantics<parallel>, #tpu.dimension_semantics<arbitrary>, #tpu.dimension_semantics<arbitrary>], iteration_bounds = array<i64: 1, 1, 1>, scalar_prefetch = 0 : i64, scratch_operands = 2 : i64, tpu.core_type = #tpu.core_type<tc>, window_params = [{transform_indices = @transform_0, window_bounds = array<i64: 16, 128>}, {transform_indices = @transform_1, window_bounds = array<i64: 128, 128>}, {transform_indices = @transform_2, window_bounds = array<i64: 1, 128>}, {transform_indices = @transform_3, window_bounds = array<i64: 128, 128>}, {transform_indices = @transform_4, window_bounds = array<i64: 128, 128>}, {transform_indices = @transform_5, window_bounds = array<i64: 16, 128>}]} {
    %c0_i32 = arith.constant 0 : i32
    %0 = arith.cmpi eq, %arg2, %c0_i32 : i32
    %1 = arith.extui %0 : i1 to i32
    %c0_i32_0 = arith.constant 0 : i32
    %2 = arith.cmpi ne, %1, %c0_i32_0 : i32
    scf.if %2 {
      %cst_12 = arith.constant 0.000000e+00 : f32
      %15 = vector.broadcast %cst_12 : f32 to vector<16x128xf32>
      %c0_13 = arith.constant 0 : index
      %c0_14 = arith.constant 0 : index
      %16 = vector.load %arg9[%c0_13, %c0_14] : memref<16x128xf32, #tpu.memory_space<vmem>>, vector<16x128xf32>
      tpu.vector_store %arg9[%c0_13, %c0_14], %15 {strides = array<i32>} : memref<16x128xf32, #tpu.memory_space<vmem>>, vector<16x128xf32>,
    } else {
    }
    %c0 = arith.constant 0 : index
    %c0_1 = arith.constant 0 : index
    %3 = vector.load %arg3[%c0, %c0_1] : memref<16x128xbf16, #tpu.memory_space<vmem>>, vector<16x128xbf16>
    %c0_2 = arith.constant 0 : index
    %c0_3 = arith.constant 0 : index
    %4 = vector.load %arg9[%c0_2, %c0_3] : memref<16x128xf32, #tpu.memory_space<vmem>>, vector<16x128xf32>
    %c0_4 = arith.constant 0 : index
    %c0_5 = arith.constant 0 : index
    %5 = vector.load %arg4[%c0_4, %c0_5] : memref<128x128xbf16, #tpu.memory_space<vmem>>, vector<128x128xbf16>
    %cst = arith.constant dense<0.000000e+00> : vector<16x128xf32>
    %6 = tpu.matmul %3, %5, %cst {dimension_numbers = #tpu.dot_dimension_numbers<[1], [0], [0], [1], [0, 0, 1, 1], [], []>} : vector<16x128xbf16>, vector<128x128xbf16>, vector<16x128xf32> -> vector<16x128xf32>
    %7 = arith.addf %4, %6 : vector<16x128xf32>
    %c0_6 = arith.constant 0 : index
    %c0_7 = arith.constant 0 : index
    %8 = vector.load %arg9[%c0_6, %c0_7] : memref<16x128xf32, #tpu.memory_space<vmem>>, vector<16x128xf32>
    tpu.vector_store %arg9[%c0_6, %c0_7], %7 {strides = array<i32>} : memref<16x128xf32, #tpu.memory_space<vmem>>, vector<16x128xf32>,
    %c0_i32_8 = arith.constant 0 : i32
    %9 = arith.cmpi eq, %arg1, %c0_i32_8 : i32
    %10 = arith.extui %9 : i1 to i32
    %c0_i32_9 = arith.constant 0 : i32
    %11 = arith.cmpi ne, %10, %c0_i32_9 : i32
    scf.if %11 {
      %c0_i32_12 = arith.constant 0 : i32
      %15 = arith.cmpi eq, %arg2, %c0_i32_12 : i32
      %16 = arith.extui %15 : i1 to i32
      %c0_i32_13 = arith.constant 0 : i32
      %17 = arith.cmpi ne, %16, %c0_i32_13 : i32
      scf.if %17 {
        %cst_21 = arith.constant 0.000000e+00 : f32
        %23 = vector.broadcast %cst_21 : f32 to vector<16x128xf32>
        %c0_22 = arith.constant 0 : index
        %c0_23 = arith.constant 0 : index
        %24 = vector.load %arg10[%c0_22, %c0_23] : memref<16x128xf32, #tpu.memory_space<vmem>>, vector<16x128xf32>
        tpu.vector_store %arg10[%c0_22, %c0_23], %23 {strides = array<i32>} : memref<16x128xf32, #tpu.memory_space<vmem>>, vector<16x128xf32>,
      } else {
      }
      %c0_14 = arith.constant 0 : index
      %c0_15 = arith.constant 0 : index
      %18 = vector.load %arg10[%c0_14, %c0_15] : memref<16x128xf32, #tpu.memory_space<vmem>>, vector<16x128xf32>
      %c0_16 = arith.constant 0 : index
      %c0_17 = arith.constant 0 : index
      %19 = vector.load %arg6[%c0_16, %c0_17] : memref<128x128xbf16, #tpu.memory_space<vmem>>, vector<128x128xbf16>
      %cst_18 = arith.constant dense<0.000000e+00> : vector<16x128xf32>
      %20 = tpu.matmul %3, %19, %cst_18 {dimension_numbers = #tpu.dot_dimension_numbers<[1], [0], [0], [1], [0, 0, 1, 1], [], []>} : vector<16x128xbf16>, vector<128x128xbf16>, vector<16x128xf32> -> vector<16x128xf32>
      %21 = arith.addf %18, %20 : vector<16x128xf32>
      %c0_19 = arith.constant 0 : index
      %c0_20 = arith.constant 0 : index
      %22 = vector.load %arg10[%c0_19, %c0_20] : memref<16x128xf32, #tpu.memory_space<vmem>>, vector<16x128xf32>
      tpu.vector_store %arg10[%c0_19, %c0_20], %21 {strides = array<i32>} : memref<16x128xf32, #tpu.memory_space<vmem>>, vector<16x128xf32>,
    } else {
    }
    %c0_i32_10 = arith.constant 0 : i32
    %12 = arith.cmpi eq, %arg2, %c0_i32_10 : i32
    %13 = arith.extui %12 : i1 to i32
    %c0_i32_11 = arith.constant 0 : i32
    %14 = arith.cmpi ne, %13, %c0_i32_11 : i32
    scf.if %14 {
      %c0_12 = arith.constant 0 : index
      %c0_13 = arith.constant 0 : index
      %15 = vector.load %arg10[%c0_12, %c0_13] : memref<16x128xf32, #tpu.memory_space<vmem>>, vector<16x128xf32>
      %c0_14 = arith.constant 0 : index
      %c0_15 = arith.constant 0 : index
      %16 = vector.load %arg7[%c0_14, %c0_15] : memref<128x128xf32, #tpu.memory_space<vmem>>, vector<128x128xf32>
      %cst_16 = arith.constant dense<0.000000e+00> : vector<16x128xf32>
      %17 = tpu.matmul %15, %16, %cst_16 {dimension_numbers = #tpu.dot_dimension_numbers<[1], [0], [0], [1], [0, 0, 1, 1], [], []>} : vector<16x128xf32>, vector<128x128xf32>, vector<16x128xf32> -> vector<16x128xf32>
      %c0_17 = arith.constant 0 : index
      %c0_18 = arith.constant 0 : index
      %18 = vector.load %arg9[%c0_17, %c0_18] : memref<16x128xf32, #tpu.memory_space<vmem>>, vector<16x128xf32>
      %c0_19 = arith.constant 0 : index
      %c0_20 = arith.constant 0 : index
      %19 = vector.load %arg5[%c0_19, %c0_20] : memref<1x128xf32, #tpu.memory_space<vmem>>, vector<1x128xf32>
      %20 = vector.broadcast %19 : vector<1x128xf32> to vector<16x128xf32>
      %21 = arith.addf %18, %20 : vector<16x128xf32>
      %22 = arith.addf %21, %17 : vector<16x128xf32>
      %c0_21 = arith.constant 0 : index
      %c0_22 = arith.constant 0 : index
      %23 = vector.load %arg8[%c0_21, %c0_22] : memref<16x128xf32, #tpu.memory_space<vmem>>, vector<16x128xf32>
      tpu.vector_store %arg8[%c0_21, %c0_22], %22 {strides = array<i32>} : memref<16x128xf32, #tpu.memory_space<vmem>>, vector<16x128xf32>,
    } else {
    }
    return
  }
  func.func @transform_0(%arg0: i32, %arg1: i32, %arg2: i32) -> (i32, i32) {
    %c0_i32 = arith.constant 0 : i32
    return %arg0, %arg2 : i32, i32
  }
  func.func @transform_1(%arg0: i32, %arg1: i32, %arg2: i32) -> (i32, i32) {
    %c0_i32 = arith.constant 0 : i32
    return %arg2, %arg1 : i32, i32
  }
  func.func @transform_2(%arg0: i32, %arg1: i32, %arg2: i32) -> (i32, i32) {
    %c0_i32 = arith.constant 0 : i32
    %c0_i32_0 = arith.constant 0 : i32
    return %c0_i32, %arg1 : i32, i32
  }
  func.func @transform_3(%arg0: i32, %arg1: i32, %arg2: i32) -> (i32, i32) {
    %c0_i32 = arith.constant 0 : i32
    %c0_i32_0 = arith.constant 0 : i32
    return %arg2, %c0_i32 : i32, i32
  }
  func.func @transform_4(%arg0: i32, %arg1: i32, %arg2: i32) -> (i32, i32) {
    %c0_i32 = arith.constant 0 : i32
    %c0_i32_0 = arith.constant 0 : i32
    return %c0_i32, %arg1 : i32, i32
  }
  func.func @transform_5(%arg0: i32, %arg1: i32, %arg2: i32) -> (i32, i32) {
    %c0_i32 = arith.constant 0 : i32
    return %arg0, %arg1 : i32, i32
  }
}

</mosaic_0001>

<bundles_post_ra>
// kernel: tpu_custom_call.1
= control target key start
LH: loop header
LB: loop body
LE: loop exit
PB: predicated region body
PF: predicated region fallthrough
CT: control target
= control target key end

     0   :  { %10 = vsyncpa [#allocation5], 0  ;;  %s782_s0 = inlined_call_operand.hbm [shape: bf16[16,128], index: 0, kind: input, shape index: {}]   ;;  %s783_s1 = inlined_call_operand.hbm [shape: bf16[128,128], index: 1, kind: input, shape index: {}]   ;;  %s784_s2 = inlined_call_operand.vmem [shape: f32[1,128], index: 2, kind: input, shape index: {}]   ;;  %s785_s3 = inlined_call_operand.hbm [shape: bf16[128,128], index: 3, kind: input, shape index: {}]   ;;  %s786_s4 = inlined_call_operand.hbm [shape: f32[128,128], index: 4, kind: input, shape index: {}]   ;;  %s787_s5 = inlined_call_operand.hbm [shape: f32[16,128], index: 5, kind: output, shape index: {}]  }
   0x1   :  { %11 = vsyncpa [#allocation8], 0 }
   0x2   :  { %12 = vsyncpa [#allocation11], 0 }
   0x3   :  { %13 = vsyncpa [#allocation6], 0  ;;  %s717_s18 = smov [#allocation7]   ;;  %s718_s20 = smov [#allocation4]  }
   0x4   :  { %s31_s19 = sshll.u32 %s717_s18, 4  ;;  %s19_s21 = sshll.u32 %s718_s20, 4  ;;  %s32_s19 = int_to_ptr.vmem [resolvable:$true] %s31_s19  ;;  %s20_s21 = int_to_ptr.vmem [resolvable:$true] %s19_s21 }
   0x5   :  { %s617_s22 = scalar_lea.vmem %s32_s19, 1024  ;;  %p622_p1 = scmp.lt.s32.totalorder %s32_s19, %s32_s19 }
   0x6   :  { %p618_p0 = scmp.ne.s32.totalorder %s32_s19, %s617_s22  ;;  %p623_p2 = scmp.lt.s32.totalorder %s617_s22, %s617_s22 }
   0x8   :  { %p624_p3 = por %p623_p2, %p622_p1 }
   0xa   :  { %p625_p4 = pnand %p624_p3, %p618_p0 }
   0xc   :  { %628 = shalt.err (!%p625_p4)
}
   0xd   :  { %s719_s23 = smov 64   ;;  %s720_s24 = smov 4  }
   0xe   :  { %37 = dma.hbm_to_vmem [thread:$0]  %s783_s1, 1024, %s32_s19, [#allocation8], %s719_s23, %s719_s23, %s720_s24  }
   0xf   :  { %s637_s27 = scalar_lea.vmem %s20_s21, 128  ;;  %p642_p6 = scmp.lt.s32.totalorder %s20_s21, %s20_s21 }
  0x10   :  { %p638_p5 = scmp.ne.s32.totalorder %s20_s21, %s637_s27  ;;  %p643_p7 = scmp.lt.s32.totalorder %s637_s27, %s637_s27 }
  0x12   :  { %p644_p8 = por %p643_p7, %p642_p6 }
  0x14   :  { %p645_p9 = pnand %p644_p8, %p638_p5 }
  0x16   :  { %648 = shalt.err (!%p645_p9)
}
  0x17   :  { %25 = dma.hbm_to_vmem [thread:$0]  %s782_s0, 128, %s20_s21, [#allocation5], %s719_s23, %s719_s23, %s720_s24  }
  0x18   :  { %s721_s30 = smov [#allocation9]   ;;  %s722_s7 = smov [#allocation10]  }
  0x19   :  { %s45_s6 = sshll.u32 %s721_s30, 4  ;;  %s57_s8 = sshll.u32 %s722_s7, 4  ;;  %s46_s6 = int_to_ptr.vmem [resolvable:$true] %s45_s6  ;;  %s58_s8 = int_to_ptr.vmem [resolvable:$true] %s57_s8 }
  0x1a   :  { %s657_s9 = scalar_lea.vmem %s46_s6, 1024  ;;  %p662_p11 = scmp.lt.s32.totalorder %s46_s6, %s46_s6 }
  0x1b   :  { %p658_p10 = scmp.ne.s32.totalorder %s46_s6, %s657_s9  ;;  %p663_p12 = scmp.lt.s32.totalorder %s657_s9, %s657_s9 }
  0x1d   :  { %p664_p13 = por %p663_p12, %p662_p11 }
  0x1f   :  { %p665_p0 = pnand %p664_p13, %p658_p10 }
  0x21   :  { %668 = shalt.err (!%p665_p0)
}
  0x22   :  { %51 = dma.hbm_to_vmem [thread:$0]  %s785_s3, 1024, %s46_s6, [#allocation8], %s719_s23, %s719_s23, %s720_s24  }
  0x23   :  { %s677_s11 = scalar_lea.vmem %s58_s8, 2048  ;;  %p682_p2 = scmp.lt.s32.totalorder %s58_s8, %s58_s8 }
  0x24   :  { %p678_p1 = scmp.ne.s32.totalorder %s58_s8, %s677_s11  ;;  %p683_p3 = scmp.lt.s32.totalorder %s677_s11, %s677_s11 }
  0x26   :  { %p684_p4 = por %p683_p3, %p682_p2 }
  0x28   :  { %p685_p5 = pnand %p684_p4, %p678_p1 }
  0x2a   :  { %688 = shalt.err (!%p685_p5)
}
  0x2b   :  { %s723_s0 = smov 128   ;;  %s724_s12 = smov 8  }
  0x2c   :  { %63 = dma.hbm_to_vmem [thread:$0]  %s786_s4, 2048, %s58_s8, [#allocation11], %s723_s0, %s723_s0, %s724_s12  }
  0x2d   :  { %709 = dma.done.wait [#allocation5], 128  }
  0x2e   :  { %710 = vsyncadd [#allocation5], 4294967168 }
  0x2f   :  { %711 = dma.done.wait [#allocation8], 2048  }
  0x30   :  { %712 = vsyncadd [#allocation8], 4294965248 }
  0x31   :  { %713 = dma.done.wait [#allocation11], 2048  }
  0x32   :  { %714 = vsyncadd [#allocation11], 4294965248  ;;  %v725_v0 = vmov 0.0   ;;  %vm726_vm0 = vmmov 0   ;;  %v592_v1 = vld [vmem:[#allocation9 + $0x38] sm:$0xff]   ;;  %v593_v2 = vld [vmem:[#allocation9 + $0x30] sm:$0xff]  }
  0x33   :  { %526 = vmatprep.subr.bf16.mxu1 %v725_v0  ;;  %542 = vmatprep.mubr.msk.bf16.mxu1 %vm726_vm0, %v725_v0  ;;  %v594_v3 = vld [vmem:[#allocation9 + $0x28] sm:$0xff]   ;;  %v601_v4 = vld [vmem:[#allocation7 + $0x38] sm:$0xff]   ;;  %v595_v5 = vld [vmem:[#allocation9 + $0x20] sm:$0xff]   ;;  %s727_s15 = smov [#allocation12]  }
  0x34   :  { %506 = vmatprep.subr.bf16.mxu0 %v725_v0  ;;  %522 = vmatprep.mubr.msk.bf16.mxu0 %vm726_vm0, %v725_v0  ;;  %v602_v6 = vld [vmem:[#allocation7 + $0x30] sm:$0xff]   ;;  %v596_v7 = vld [vmem:[#allocation9 + $0x18] sm:$0xff]   ;;  %v603_v8 = vld [vmem:[#allocation7 + $0x28] sm:$0xff]   ;;  %s438_s16 = sshll.u32 %s727_s15, 4  ;;  %s439_s16 = int_to_ptr.vmem [resolvable:$true] %s438_s16 }
  0x35   :  { %527 = vmatpush3.bf16.msra.mxu1 %v592_v1  ;;  %507 = vmatpush3.bf16.msra.mxu0 %v601_v4  ;;  %v597_v9 = vld [vmem:[#allocation9 + $0x10] sm:$0xff]   ;;  %v604_v10 = vld [vmem:[#allocation7 + $0x20] sm:$0xff]   ;;  %v598_v11 = vld [vmem:[#allocation9 + $0x8] sm:$0xff]   ;;  %s689_s17 = scalar_lea.vmem %s439_s16, 256  ;;  %p694_p7 = scmp.lt.s32.totalorder %s439_s16, %s439_s16 }
  0x36   :  { %528 = vmatprep.subr.bf16.mxu1 %v725_v0  ;;  %508 = vmatprep.subr.bf16.mxu0 %v725_v0  ;;  %v605_v12 = vld [vmem:[#allocation7 + $0x18] sm:$0xff]   ;;  %v599_v13 = vld [vmem:[#allocation9] sm:$0xff]   ;;  %v606_v14 = vld [vmem:[#allocation7 + $0x10] sm:$0xff]   ;;  %p690_p6 = scmp.ne.s32.totalorder %s439_s16, %s689_s17  ;;  %p695_p8 = scmp.lt.s32.totalorder %s689_s17, %s689_s17 }
  0x37   :  { %v600_v15 = vld [vmem:[#allocation4] sm:$0xff]   ;;  %v607_v16 = vld [vmem:[#allocation7 + $0x8] sm:$0xff]   ;;  %v608_v17 = vld [vmem:[#allocation7] sm:$0xff]  }
  0x38   :  { %v342_v18 = vld [vmem:[#allocation10 + $0x78] sm:$0xff]  ;;  %v341_v19 = vld [vmem:[#allocation10 + $0x70] sm:$0xff]  ;;  %v340_v20 = vld [vmem:[#allocation10 + $0x68] sm:$0xff]  ;;  %p696_p9 = por %p695_p8, %p694_p7 }
  0x39   :  { %529 = vmatpush3.bf16.msra.mxu1 %v593_v2  ;;  %509 = vmatpush3.bf16.msra.mxu0 %v602_v6  ;;  %v339_v21 = vld [vmem:[#allocation10 + $0x60] sm:$0xff]  ;;  %v338_v22 = vld [vmem:[#allocation10 + $0x58] sm:$0xff]  ;;  %v337_v23 = vld [vmem:[#allocation10 + $0x50] sm:$0xff] }
  0x3a   :  { %530 = vmatprep.subr.bf16.mxu1 %v725_v0  ;;  %510 = vmatprep.subr.bf16.mxu0 %v725_v0  ;;  %v336_v24 = vld [vmem:[#allocation10 + $0x48] sm:$0xff]  ;;  %v335_v25 = vld [vmem:[#allocation10 + $0x40] sm:$0xff]  ;;  %v334_v26 = vld [vmem:[#allocation10 + $0x38] sm:$0xff]  ;;  %p697_p10 = pnand %p696_p9, %p690_p6 }
  0x3b   :  { %v333_v27 = vld [vmem:[#allocation10 + $0x30] sm:$0xff]  ;;  %v332_v28 = vld [vmem:[#allocation10 + $0x28] sm:$0xff]  ;;  %v331_v29 = vld [vmem:[#allocation10 + $0x20] sm:$0xff] }
  0x3c   :  { %v330_v30 = vld [vmem:[#allocation10 + $0x18] sm:$0xff]  ;;  %v329_v31 = vld [vmem:[#allocation10 + $0x10] sm:$0xff]  ;;  %v328_v32 = vld [vmem:[#allocation10 + $0x8] sm:$0xff] }
  0x3d   :  { %531 = vmatpush3.bf16.msra.mxu1 %v594_v3  ;;  %511 = vmatpush3.bf16.msra.mxu0 %v603_v8  ;;  %v327_v33 = vld [vmem:[#allocation10] sm:$0xff]  ;;  %v469_v42 = vld [vmem:[%s784_s2] ss:$0 sm:$0xff] }
  0x3e   :  { %532 = vmatprep.subr.bf16.mxu1 %v725_v0  ;;  %512 = vmatprep.subr.bf16.mxu0 %v725_v0 }
  0x41   :  { %533 = vmatpush3.bf16.msra.mxu1 %v595_v5  ;;  %513 = vmatpush3.bf16.msra.mxu0 %v604_v10 }
  0x42   :  { %534 = vmatprep.subr.bf16.mxu1 %v725_v0  ;;  %514 = vmatprep.subr.bf16.mxu0 %v725_v0 }
  0x45   :  { %535 = vmatpush3.bf16.msra.mxu1 %v596_v7  ;;  %515 = vmatpush3.bf16.msra.mxu0 %v605_v12 }
  0x46   :  { %536 = vmatprep.subr.bf16.mxu1 %v725_v0  ;;  %516 = vmatprep.subr.bf16.mxu0 %v725_v0 }
  0x49   :  { %537 = vmatpush3.bf16.msra.mxu1 %v597_v9  ;;  %517 = vmatpush3.bf16.msra.mxu0 %v606_v14 }
  0x4a   :  { %538 = vmatprep.subr.bf16.mxu1 %v725_v0  ;;  %518 = vmatprep.subr.bf16.mxu0 %v725_v0 }
  0x4d   :  { %539 = vmatpush3.bf16.msra.mxu1 %v598_v11  ;;  %519 = vmatpush3.bf16.msra.mxu0 %v607_v16 }
  0x4e   :  { %540 = vmatprep.subr.bf16.mxu1 %v725_v0  ;;  %520 = vmatprep.subr.bf16.mxu0 %v725_v0 }
  0x51   :  { %541 = vmatpush3.bf16.msra.mxu1 %v599_v13  ;;  %521 = vmatpush3.bf16.msra.mxu0 %v608_v17 }
  0x52   :  { %546 = vmatprep.subr.mxu0 %v342_v18 }
  0x54   :  { %543 = vmatmul.mubr.bf16.vlgmr.msra.gmra.mxu1 %v600_v15  ;;  %523 = vmatmul.mubr.bf16.vlgmr.msra.gmra.mxu0 %v600_v15 }
  0x55   :  { %547 = vmatpush3.msra.mxu0 %v342_v18 }
  0x56   :  { %548 = vmatprep.subr.mxu0 %v341_v19 }
  0x57   :  { %549 = vmatpush3.msra.mxu0 %v341_v19 }
  0x58   :  { %550 = vmatprep.subr.mxu0 %v340_v20 }
  0x59   :  { %551 = vmatpush3.msra.mxu0 %v340_v20 }
  0x5a   :  { %552 = vmatprep.subr.mxu0 %v339_v21 }
  0x5b   :  { %553 = vmatpush3.msra.mxu0 %v339_v21 }
  0x5c   :  { %554 = vmatprep.subr.mxu0 %v338_v22 }
  0x5d   :  { %555 = vmatpush3.msra.mxu0 %v338_v22 }
  0x5e   :  { %556 = vmatprep.subr.mxu0 %v337_v23 }
  0x5f   :  { %557 = vmatpush3.msra.mxu0 %v337_v23 }
  0x60   :  { %558 = vmatprep.subr.mxu0 %v336_v24 }
  0x61   :  { %559 = vmatpush3.msra.mxu0 %v336_v24 }
  0x62   :  { %560 = vmatprep.subr.mxu0 %v335_v25 }
  0x63   :  { %561 = vmatpush3.msra.mxu0 %v335_v25 }
  0x64   :  { %562 = vmatprep.subr.mxu0 %v334_v26 }
  0x65   :  { %563 = vmatpush3.msra.mxu0 %v334_v26 }
  0x66   :  { %564 = vmatprep.subr.mxu0 %v333_v27 }
  0x67   :  { %565 = vmatpush3.msra.mxu0 %v333_v27 }
  0x68   :  { %566 = vmatprep.subr.mxu0 %v332_v28 }
  0x69   :  { %567 = vmatpush3.msra.mxu0 %v332_v28 }
  0x6a   :  { %568 = vmatprep.subr.mxu0 %v331_v29 }
  0x6b   :  { %569 = vmatpush3.msra.mxu0 %v331_v29 }
  0x6c   :  { %570 = vmatprep.subr.mxu0 %v330_v30 }
  0x6d   :  { %571 = vmatpush3.msra.mxu0 %v330_v30 }
  0x6e   :  { %572 = vmatprep.subr.mxu0 %v329_v31 }
  0x6f   :  { %573 = vmatpush3.msra.mxu0 %v329_v31 }
  0x70   :  { %574 = vmatprep.subr.mxu0 %v328_v32 }
  0x71   :  { %575 = vmatpush3.msra.mxu0 %v328_v32 }
  0x72   :  { %576 = vmatprep.subr.mxu0 %v327_v33 }
  0x73   :  { %577 = vmatpush3.msra.mxu0 %v327_v33 }
 0x114   :  { %v311_v34 = vpop.f32.mrf.mxu1  ;;  %v191_v38 = vpop.f32.mrf.mxu0 }
 0x115   :  { %578 = vmatprep.mubr.f32.mxu0 %v311_v34  ;;  %v427_v45 = vadd.f32 %v469_v42, %v191_v38 }
 0x116   :  { %v544_v35 = vpop.f32.mrf.mxu1  ;;  %v524_v39 = vpop.f32.mrf.mxu0 }
 0x118   :  { %v314_v36 = vpop.f32.mrf.mxu1  ;;  %v194_v40 = vpop.f32.mrf.mxu0 }
 0x119   :  { %579 = vmatmul.mubr.f32.vlgmr.msra.gmra.mxu0 %v314_v36  ;;  %v428_v43 = vadd.f32 %v469_v42, %v194_v40 }
 0x11a   :  { %v545_v37 = vpop.f32.mrf.mxu1  ;;  %v525_v41 = vpop.f32.mrf.mxu0 }
 0x1d9   :  { %v580_v44 = vpop.f32.mrf.mxu0 }
 0x1da   :  { %v430_v46 = vadd.f32 %v580_v44, %v428_v43 }
 0x1db   :  { %v409_v47 = vpop.f32.mrf.mxu0 }
 0x1dc   :  { %432 = vst [vmem:[#allocation12 + $0x8] sm:$0xff] %v430_v46  ;;  %v429_v48 = vadd.f32 %v427_v45, %v409_v47 }
 0x1de   :  { %431 = vst [vmem:[#allocation12] sm:$0xff] %v429_v48 }
 0x1df   :  { %700 = shalt.err (!%p697_p10)
}
 0x1e0   :  { %444 = dma.vmem_to_hbm [thread:$0]  %s439_s16, 256, %s787_s5, [#allocation6], %s723_s0, %s723_s0, %s724_s12  }
 0x1e1   :  { %715 = dma.done.wait [#allocation6], 256  }
 0x1e2   :  { %716 = vsyncadd [#allocation6], 4294967040 }
 0x1e3   :  { %448 = vsyncpa [#allocation5], 1 }
 0x1e4   :  { %449 = vsyncpa [#allocation8], 1 }
 0x1e5   :  { %450 = vsyncpa [#allocation11], 1 }
 0x1e6   :  { %451 = vsyncpa [#allocation6], 1 }

</bundles_post_ra>
